<compile_context>
chip_gen: v5e
topology: v5e:2x2
jax: 0.10.0
libtpu: 0.0.40
codegen_flags: <defaults>
</compile_context>

<pallas_src>
import functools
import math

import jax
import jax.numpy as jnp
from jax.experimental import pallas as pl
from jax.experimental.pallas import tpu as pltpu


# ----------------------------------------------------------------------------
# Pallas kernel
# ----------------------------------------------------------------------------
def _rca_kernel(ident_ref, qin_ref, kin_ref, mem_ref, w_ref, vec_ref, out_ref,
                *, nhead, head_dim):
    nb, L, E = qin_ref.shape
    S = kin_ref.shape[1]
    m_q = nb * L
    m_kv = nb * S

    f32 = jnp.float32
    bf16 = jnp.bfloat16

    # Flatten the folded batch into the row (sublane) dimension — layout no-op.
    q_in = qin_ref[...].reshape(m_q, E)     # bf16: tgt + query_pos (added in wrapper)
    k_in = kin_ref[...].reshape(m_kv, E)    # bf16: key + pos       (added in wrapper)
    v_in = mem_ref[...].reshape(m_kv, E)    # bf16: memory

    # in_proj: bf16 operands on the MXU, f32 accumulation, bias/scale in f32,
    # then a single cast to bf16 (keeps q/k/v small while live across the
    # unrolled head loop).  Weights pre-transposed to (E_in, E_out) in wrapper.
    scale = 1.0 / math.sqrt(head_dim)
    q = ((jnp.dot(q_in, w_ref[0], preferred_element_type=f32)
          + vec_ref[0]) * scale).astype(bf16)
    k = (jnp.dot(k_in, w_ref[1], preferred_element_type=f32)
         + vec_ref[1]).astype(bf16)
    v = (jnp.dot(v_in, w_ref[2], preferred_element_type=f32)
         + vec_ref[2]).astype(bf16)

    q = q.reshape(nb, L, E)
    k = k.reshape(nb, S, E)
    v = v.reshape(nb, S, E)

    # Per-head attention, batched over the folded batch dim.  Head outputs stay
    # in vregs; one concatenate feeds the out-projection (no masked lane-offset
    # stores into a VMEM scratch).
    # Softmax exponent kept f32 for v5e portability / parity (on v6e/v7x a
    # bf16 exp would use the EUP bf16 path).
    # TODO(synk): for production S, chunk this over S tiles with an
    # online-softmax (m/l/acc) accumulator so full (nb,S,E) / (nb,L,S) never
    # materialize (required to fit v7x's 64 MiB VMEM at large S).
    head_outs = []
    for h in range(nhead):
        lo = h * head_dim
        hi = lo + head_dim
        qh = q[:, :, lo:hi]                                  # (nb, L, hd) bf16
        kh = k[:, :, lo:hi]                                  # (nb, S, hd) bf16
        vh = v[:, :, lo:hi]                                  # (nb, S, hd) bf16

        s = jnp.einsum('bld,bsd->bls', qh, kh,
                       preferred_element_type=f32)           # (nb, L, S) f32
        s = s - jnp.max(s, axis=-1, keepdims=True)
        p = jnp.exp(s)
        p = p * pl.reciprocal(jnp.sum(p, axis=-1, keepdims=True), approx=True)

        oh = jnp.einsum('bls,bsd->bld', p.astype(bf16), vh,
                        preferred_element_type=f32)          # (nb, L, hd) f32
        head_outs.append(oh.astype(bf16))

    attn_b = jnp.concatenate(head_outs, axis=-1)             # (nb, L, E) bf16

    # out_proj + residual (dropout == 0 -> identity) + LayerNorm (all f32 math).
    attn = jnp.dot(attn_b.reshape(m_q, E), w_ref[3],
                   preferred_element_type=f32) + vec_ref[3]
    x = ident_ref[...].reshape(m_q, E) + attn
    mean = jnp.mean(x, axis=-1, keepdims=True)
    var = jnp.mean((x - mean) ** 2, axis=-1, keepdims=True)
    y = (x - mean) * jax.lax.rsqrt(var + 1e-5)
    y = y * vec_ref[4] + vec_ref[5]
    out_ref[...] = y.astype(out_ref.dtype).reshape(nb, L, E)


# ----------------------------------------------------------------------------
# Block-size selection (VMEM-budget aware)
# ----------------------------------------------------------------------------
def _estimate_vmem_bytes(nb, l, s, e):
    """Rough per-grid-step VMEM footprint for batch-block nb (bytes)."""
    bf16, f32 = 2, 4
    # Pipelined (double-buffered) operand / result blocks.
    act_in = nb * l * e * (f32 + bf16)          # ident (f32) + q-input (bf16)
    act_in += nb * s * e * (bf16 + bf16)        # k-input + memory (bf16)
    act_out = nb * l * e * f32                  # output block
    consts = 4 * e * e * bf16 + 8 * e * f32     # weight pack + vec pack
    buffered = 2 * (act_in + act_out + consts)
    # Live in-kernel values (rough): q/k/v bf16, one head's scores (x2), x/y f32,
    # concatenated attn bf16.
    live = (nb * (l + 2 * s) * e * bf16
            + 2 * nb * l * s * f32
            + nb * l * e * (2 * f32 + bf16))
    return buffered + live


def _choose_batch_block(n, l, s, e, target_rows=512, vmem_budget=40 << 20):
    """Largest nb dividing n with nb*l <= target_rows that fits the VMEM budget.

    Keeps >= 2 grid steps when n >= 2, and prefers an even number of grid steps
    (the single 'parallel' axis is sharded across v7x's 2 TensorCores)."""
    valid = []
    for cand in range(1, n + 1):
        if n % cand:
            continue
        steps = n // cand
        if n >= 2 and steps < 2:
            continue
        if cand * l > max(target_rows, l):
            continue
        if _estimate_vmem_bytes(cand, l, s, e) > vmem_budget:
            continue
        valid.append(cand)
    if not valid:
        valid = [1]
    even_steps = [c for c in valid if (n // c) % 2 == 0]
    pool = even_steps if even_steps else valid
    return max(pool)


# ----------------------------------------------------------------------------
# Wrapper
# ----------------------------------------------------------------------------
def referring_cross_attention_pallas(identify, tgt, key, memory, params, nhead,
                                     query_pos=None, pos=None, batch_block=None):
    """Inputs are PyTorch-convention seq-first: identify/tgt (L,N,E), key/memory (S,N,E)."""
    L, N, E = tgt.shape
    S = key.shape[0]
    assert E % nhead == 0
    head_dim = E // nhead

    # Fold positional embeddings into the wrapper (fused by XLA with the
    # transpose + bf16 cast) so only 4 activation streams are DMA'd per step.
    q_in = tgt if query_pos is None else tgt + query_pos
    k_in = key if pos is None else key + pos
    # TODO(synk): memory_mask / memory_key_padding_mask (None in this code path) not implemented.

    def to_batch_major(x, dt):   # (seq, N, E) -> (N, seq, E), cast for DMA
        return jnp.transpose(x, (1, 0, 2)).astype(dt)

    ident_b = to_batch_major(identify, jnp.float32)   # residual/LN path stays f32
    qin_b = to_batch_major(q_in, jnp.bfloat16)        # bf16 streams: half the DMA bytes
    kin_b = to_batch_major(k_in, jnp.bfloat16)
    mem_b = to_batch_major(memory, jnp.bfloat16)

    nb = batch_block if batch_block is not None else _choose_batch_block(N, L, S, E)
    assert N % nb == 0
    grid = (N // nb,)

    # Pack weights (pre-transposed so kernel does x @ W) and per-channel vectors.
    w = jnp.stack([params["wq"].T, params["wk"].T, params["wv"].T,
                   params["wo"].T]).astype(jnp.bfloat16)                 # (4, E, E)
    zeros = jnp.zeros((E,), jnp.float32)
    vec = jnp.stack([params["bq"], params["bk"], params["bv"], params["bo"],
                     params["gamma"], params["beta"], zeros, zeros])     # (8, E)

    spec_L = pl.BlockSpec((nb, L, E), lambda b: (b, 0, 0))
    spec_S = pl.BlockSpec((nb, S, E), lambda b: (b, 0, 0))
    # Constant index_map -> Mosaic skips re-DMA across grid steps.
    # (pipeline_mode=pl.Buffered(1) would also drop the second VMEM buffer for
    #  these; left at the default for portability across jax versions.)
    spec_W = pl.BlockSpec((4, E, E), lambda b: (0, 0, 0))
    spec_V = pl.BlockSpec((8, E), lambda b: (0, 0))
    out_spec = pl.BlockSpec((nb, L, E), lambda b: (b, 0, 0))

    kernel = functools.partial(_rca_kernel, nhead=nhead, head_dim=head_dim)

    bf16_b, f32_b = 2, 4
    cost = pl.CostEstimate(
        flops=2 * N * E * E * (2 * L + 2 * S) + 4 * N * L * S * E,
        transcendentals=N * nhead * L * S,
        bytes_accessed=(N * L * E * (f32_b + bf16_b + f32_b)     # ident + qin + out
                        + N * S * E * 2 * bf16_b                 # kin + memory
                        + 4 * E * E * bf16_b + 8 * E * f32_b))   # weight/vec packs

    out_b = pl.pallas_call(
        kernel,
        out_shape=jax.ShapeDtypeStruct((N, L, E), tgt.dtype),
        grid=grid,
        in_specs=[spec_L, spec_L, spec_S, spec_S, spec_W, spec_V],
        out_specs=out_spec,
        compiler_params=pltpu.CompilerParams(
            dimension_semantics=("parallel",),
            vmem_limit_bytes=48 * 1024 * 1024),
        cost_estimate=cost,
    )(ident_b, qin_b, kin_b, mem_b, w, vec)

    return out_b.transpose(1, 0, 2)   # (N, L, E) -> (L, N, E)


# ----------------------------------------------------------------------------
# Pure-JAX reference (mirrors PyTorch forward_post exactly, f32)
# ----------------------------------------------------------------------------
def referring_cross_attention_ref(identify, tgt, key, memory, params, nhead,
                                  query_pos=None, pos=None):
    L, N, E = tgt.shape
    S = key.shape[0]
    hd = E // nhead
    if query_pos is None:
        query_pos = jnp.zeros_like(tgt)
    if pos is None:
        pos = jnp.zeros_like(key)

    q = (tgt + query_pos) @ params["wq"].T + params["bq"]
    k = (key + pos) @ params["wk"].T + params["bk"]
    v = memory @ params["wv"].T + params["bv"]

    qh = q.reshape(L, N, nhead, hd).transpose(1, 2, 0, 3)   # (N,H,L,hd)
    kh = k.reshape(S, N, nhead, hd).transpose(1, 2, 0, 3)   # (N,H,S,hd)
    vh = v.reshape(S, N, nhead, hd).transpose(1, 2, 0, 3)   # (N,H,S,hd)

    s = jnp.einsum("nhld,nhsd->nhls", qh, kh,
                   preferred_element_type=jnp.float32) / math.sqrt(hd)
    a = jax.nn.softmax(s, axis=-1)
    o = jnp.einsum("nhls,nhsd->nhld", a, vh,
                   preferred_element_type=jnp.float32)
    o = o.transpose(2, 0, 1, 3).reshape(L, N, E)
    o = o @ params["wo"].T + params["bo"]

    x = identify + o
    mean = x.mean(-1, keepdims=True)
    var = ((x - mean) ** 2).mean(-1, keepdims=True)
    return (x - mean) / jnp.sqrt(var + 1e-5) * params["gamma"] + params["beta"]


# ----------------------------------------------------------------------------
# Deterministic parameter init (shapes per nn.MultiheadAttention / LayerNorm)
# ----------------------------------------------------------------------------
def init_params(key, d_model):
    def xavier(k, shape):
        fan_out, fan_in = shape
        bound = math.sqrt(6.0 / (fan_in + fan_out))
        return jax.random.uniform(k, shape, jnp.float32, -bound, bound)

    ks = jax.random.split(key, 4)
    return {
        "wq": xavier(ks[0], (d_model, d_model)),
        "wk": xavier(ks[1], (d_model, d_model)),
        "wv": xavier(ks[2], (d_model, d_model)),
        "wo": xavier(ks[3], (d_model, d_model)),
        "bq": jnp.zeros((d_model,), jnp.float32),   # in_proj_bias (zero init)
        "bk": jnp.zeros((d_model,), jnp.float32),
        "bv": jnp.zeros((d_model,), jnp.float32),
        "bo": jnp.zeros((d_model,), jnp.float32),   # out_proj.bias (zero init)
        "gamma": jnp.ones((d_model,), jnp.float32), # LayerNorm weight
        "beta": jnp.zeros((d_model,), jnp.float32), # LayerNorm bias
    }


if __name__ == "__main__":
    d_model, nhead = 32, 4
    L, S, N = 8, 16, 2          # num queries, memory length, batch

    root = jax.random.PRNGKey(0)
    kp, k1, k2, k3, k4, k5, k6 = jax.random.split(root, 7)
    params = init_params(kp, d_model)

    identify = jax.random.normal(k1, (L, N, d_model), jnp.float32)
    tgt = jax.random.normal(k2, (L, N, d_model), jnp.float32)
    key = jax.random.normal(k3, (S, N, d_model), jnp.float32)
    memory = jax.random.normal(k4, (S, N, d_model), jnp.float32)
    query_pos = jax.random.normal(k5, (L, N, d_model), jnp.float32)
    pos = jax.random.normal(k6, (S, N, d_model), jnp.float32)

    out = referring_cross_attention_pallas(
        identify, tgt, key, memory, params, nhead, query_pos=query_pos, pos=pos)
    out = jax.block_until_ready(out)

    ref = referring_cross_attention_ref(
        identify, tgt, key, memory, params, nhead, query_pos=query_pos, pos=pos)
    assert out.shape == (L, N, d_model)
    # Tolerance accounts for bf16 MXU operands (f32 accumulation / f32 softmax
    # and LayerNorm); real bugs produce O(1) errors and still fail this check.
    assert jnp.allclose(out, ref, atol=5e-2, rtol=5e-2), "mismatch vs. JAX reference"

    print("KERNEL_OK")
</pallas_src>

<mosaic_0001>
module attributes {stable_mosaic.version = 11 : i64} {
  func.func @_rca_kernel(%arg0: i32, %arg1: memref<1x8x32xf32, #tpu.memory_space<vmem>>, %arg2: memref<1x8x32xbf16, #tpu.memory_space<vmem>>, %arg3: memref<1x16x32xbf16, #tpu.memory_space<vmem>>, %arg4: memref<1x16x32xbf16, #tpu.memory_space<vmem>>, %arg5: memref<4x32x32xbf16, #tpu.memory_space<vmem>>, %arg6: memref<8x32xf32, #tpu.memory_space<vmem>>, %arg7: memref<1x8x32xf32, #tpu.memory_space<vmem>>) attributes {dimension_semantics = [#tpu.dimension_semantics<parallel>], iteration_bounds = array<i64: 2>, scalar_prefetch = 0 : i64, scratch_operands = 0 : i64, tpu.core_type = #tpu.core_type<tc>, window_params = [{transform_indices = @transform_0, window_bounds = array<i64: 1, 8, 32>}, {transform_indices = @transform_1, window_bounds = array<i64: 1, 8, 32>}, {transform_indices = @transform_2, window_bounds = array<i64: 1, 16, 32>}, {transform_indices = @transform_3, window_bounds = array<i64: 1, 16, 32>}, {pipeline_mode = #tpu.pipeline_mode<synchronous>, transform_indices = @transform_4, window_bounds = array<i64: 4, 32, 32>}, {pipeline_mode = #tpu.pipeline_mode<synchronous>, transform_indices = @transform_5, window_bounds = array<i64: 8, 32>}, {transform_indices = @transform_6, window_bounds = array<i64: 1, 8, 32>}]} {
    %c0 = arith.constant 0 : index
    %c0_0 = arith.constant 0 : index
    %c0_1 = arith.constant 0 : index
    %0 = vector.load %arg2[%c0, %c0_0, %c0_1] : memref<1x8x32xbf16, #tpu.memory_space<vmem>>, vector<1x8x32xbf16>
    %1 = vector.shape_cast %0 : vector<1x8x32xbf16> to vector<8x32xbf16>
    %c0_2 = arith.constant 0 : index
    %c0_3 = arith.constant 0 : index
    %c0_4 = arith.constant 0 : index
    %2 = vector.load %arg3[%c0_2, %c0_3, %c0_4] : memref<1x16x32xbf16, #tpu.memory_space<vmem>>, vector<1x16x32xbf16>
    %3 = vector.shape_cast %2 : vector<1x16x32xbf16> to vector<16x32xbf16>
    %c0_5 = arith.constant 0 : index
    %c0_6 = arith.constant 0 : index
    %c0_7 = arith.constant 0 : index
    %4 = vector.load %arg4[%c0_5, %c0_6, %c0_7] : memref<1x16x32xbf16, #tpu.memory_space<vmem>>, vector<1x16x32xbf16>
    %5 = vector.shape_cast %4 : vector<1x16x32xbf16> to vector<16x32xbf16>
    %c0_8 = arith.constant 0 : index
    %c0_9 = arith.constant 0 : index
    %c0_10 = arith.constant 0 : index
    %6 = vector.load %arg5[%c0_8, %c0_9, %c0_10] : memref<4x32x32xbf16, #tpu.memory_space<vmem>>, vector<1x32x32xbf16>
    %7 = vector.shape_cast %6 : vector<1x32x32xbf16> to vector<32x32xbf16>
    %cst = arith.constant dense<0.000000e+00> : vector<8x32xf32>
    %8 = tpu.matmul %1, %7, %cst {dimension_numbers = #tpu.dot_dimension_numbers<[1], [0], [0], [1], [0, 0, 1, 1], [], []>} : vector<8x32xbf16>, vector<32x32xbf16>, vector<8x32xf32> -> vector<8x32xf32>
    %c0_11 = arith.constant 0 : index
    %c0_12 = arith.constant 0 : index
    %9 = vector.load %arg6[%c0_11, %c0_12] : memref<8x32xf32, #tpu.memory_space<vmem>>, vector<1x32xf32>
    %10 = vector.shape_cast %9 : vector<1x32xf32> to vector<32xf32>
    %11 = vector.shape_cast %10 : vector<32xf32> to vector<1x32xf32>
    %12 = vector.broadcast %11 : vector<1x32xf32> to vector<8x32xf32>
    %13 = arith.addf %8, %12 : vector<8x32xf32>
    %cst_13 = arith.constant 0.353553385 : f32
    %14 = vector.broadcast %cst_13 : f32 to vector<8x32xf32>
    %15 = arith.mulf %13, %14 : vector<8x32xf32>
    %16 = arith.truncf %15 : vector<8x32xf32> to vector<8x32xbf16>
    %c1 = arith.constant 1 : index
    %c0_14 = arith.constant 0 : index
    %c0_15 = arith.constant 0 : index
    %17 = vector.load %arg5[%c1, %c0_14, %c0_15] : memref<4x32x32xbf16, #tpu.memory_space<vmem>>, vector<1x32x32xbf16>
    %18 = vector.shape_cast %17 : vector<1x32x32xbf16> to vector<32x32xbf16>
    %cst_16 = arith.constant dense<0.000000e+00> : vector<16x32xf32>
    %19 = tpu.matmul %3, %18, %cst_16 {dimension_numbers = #tpu.dot_dimension_numbers<[1], [0], [0], [1], [0, 0, 1, 1], [], []>} : vector<16x32xbf16>, vector<32x32xbf16>, vector<16x32xf32> -> vector<16x32xf32>
    %c1_17 = arith.constant 1 : index
    %c0_18 = arith.constant 0 : index
    %20 = vector.load %arg6[%c1_17, %c0_18] : memref<8x32xf32, #tpu.memory_space<vmem>>, vector<1x32xf32>
    %21 = vector.shape_cast %20 : vector<1x32xf32> to vector<32xf32>
    %22 = vector.shape_cast %21 : vector<32xf32> to vector<1x32xf32>
    %23 = vector.broadcast %22 : vector<1x32xf32> to vector<16x32xf32>
    %24 = arith.addf %19, %23 : vector<16x32xf32>
    %25 = arith.truncf %24 : vector<16x32xf32> to vector<16x32xbf16>
    %c2 = arith.constant 2 : index
    %c0_19 = arith.constant 0 : index
    %c0_20 = arith.constant 0 : index
    %26 = vector.load %arg5[%c2, %c0_19, %c0_20] : memref<4x32x32xbf16, #tpu.memory_space<vmem>>, vector<1x32x32xbf16>
    %27 = vector.shape_cast %26 : vector<1x32x32xbf16> to vector<32x32xbf16>
    %cst_21 = arith.constant dense<0.000000e+00> : vector<16x32xf32>
    %28 = tpu.matmul %5, %27, %cst_21 {dimension_numbers = #tpu.dot_dimension_numbers<[1], [0], [0], [1], [0, 0, 1, 1], [], []>} : vector<16x32xbf16>, vector<32x32xbf16>, vector<16x32xf32> -> vector<16x32xf32>
    %c2_22 = arith.constant 2 : index
    %c0_23 = arith.constant 0 : index
    %29 = vector.load %arg6[%c2_22, %c0_23] : memref<8x32xf32, #tpu.memory_space<vmem>>, vector<1x32xf32>
    %30 = vector.shape_cast %29 : vector<1x32xf32> to vector<32xf32>
    %31 = vector.shape_cast %30 : vector<32xf32> to vector<1x32xf32>
    %32 = vector.broadcast %31 : vector<1x32xf32> to vector<16x32xf32>
    %33 = arith.addf %28, %32 : vector<16x32xf32>
    %34 = arith.truncf %33 : vector<16x32xf32> to vector<16x32xbf16>
    %35 = vector.shape_cast %16 : vector<8x32xbf16> to vector<1x8x32xbf16>
    %36 = vector.shape_cast %25 : vector<16x32xbf16> to vector<1x16x32xbf16>
    %37 = vector.shape_cast %34 : vector<16x32xbf16> to vector<1x16x32xbf16>
    %38 = vector.extract_strided_slice %35 {offsets = [0, 0, 0], sizes = [1, 8, 8], strides = [1, 1, 1]} : vector<1x8x32xbf16> to vector<1x8x8xbf16>
    %39 = vector.extract_strided_slice %36 {offsets = [0, 0, 0], sizes = [1, 16, 8], strides = [1, 1, 1]} : vector<1x16x32xbf16> to vector<1x16x8xbf16>
    %40 = vector.extract_strided_slice %37 {offsets = [0, 0, 0], sizes = [1, 16, 8], strides = [1, 1, 1]} : vector<1x16x32xbf16> to vector<1x16x8xbf16>
    "tpu.trace_start"() <{level = 10 : i32, message = "bld,bsd->bls"}> : () -> ()
    %cst_24 = arith.constant dense<0.000000e+00> : vector<1x8x16xf32>
    %41 = tpu.matmul %38, %39, %cst_24 {dimension_numbers = #tpu.dot_dimension_numbers<[2], [2], [1], [1], [0, 0, 0, 1, 1, 1], [0], [0]>} : vector<1x8x8xbf16>, vector<1x16x8xbf16>, vector<1x8x16xf32> -> vector<1x8x16xf32>
    "tpu.trace_stop"() : () -> ()
    %cst_25 = arith.constant dense<0xFF800000> : vector<1x8xf32>
    %42 = vector.multi_reduction <maximumf>, %41, %cst_25 [2] : vector<1x8x16xf32> to vector<1x8xf32>
    %43 = vector.shape_cast %42 : vector<1x8xf32> to vector<1x8x1xf32>
    %44 = vector.broadcast %43 : vector<1x8x1xf32> to vector<1x8x16xf32>
    %45 = arith.subf %41, %44 : vector<1x8x16xf32>
    %46 = math.exp %45 : vector<1x8x16xf32>
    %cst_26 = arith.constant dense<0.000000e+00> : vector<1x8xf32>
    %47 = vector.multi_reduction <add>, %46, %cst_26 [2] : vector<1x8x16xf32> to vector<1x8xf32>
    %48 = vector.shape_cast %47 : vector<1x8xf32> to vector<1x8x1xf32>
    %49 = tpu.reciprocal %48 {approx = true} : vector<1x8x1xf32> -> vector<1x8x1xf32>
    %50 = vector.broadcast %49 : vector<1x8x1xf32> to vector<1x8x16xf32>
    %51 = arith.mulf %46, %50 : vector<1x8x16xf32>
    %52 = arith.truncf %51 : vector<1x8x16xf32> to vector<1x8x16xbf16>
    "tpu.trace_start"() <{level = 10 : i32, message = "bls,bsd->bld"}> : () -> ()
    %cst_27 = arith.constant dense<0.000000e+00> : vector<1x8x8xf32>
    %53 = tpu.matmul %52, %40, %cst_27 {dimension_numbers = #tpu.dot_dimension_numbers<[2], [1], [1], [2], [0, 0, 0, 1, 1, 2], [0], [0]>} : vector<1x8x16xbf16>, vector<1x16x8xbf16>, vector<1x8x8xf32> -> vector<1x8x8xf32>
    "tpu.trace_stop"() : () -> ()
    %54 = arith.truncf %53 : vector<1x8x8xf32> to vector<1x8x8xbf16>
    %55 = vector.extract_strided_slice %35 {offsets = [0, 0, 8], sizes = [1, 8, 8], strides = [1, 1, 1]} : vector<1x8x32xbf16> to vector<1x8x8xbf16>
    %56 = vector.extract_strided_slice %36 {offsets = [0, 0, 8], sizes = [1, 16, 8], strides = [1, 1, 1]} : vector<1x16x32xbf16> to vector<1x16x8xbf16>
    %57 = vector.extract_strided_slice %37 {offsets = [0, 0, 8], sizes = [1, 16, 8], strides = [1, 1, 1]} : vector<1x16x32xbf16> to vector<1x16x8xbf16>
    "tpu.trace_start"() <{level = 10 : i32, message = "bld,bsd->bls"}> : () -> ()
    %cst_28 = arith.constant dense<0.000000e+00> : vector<1x8x16xf32>
    %58 = tpu.matmul %55, %56, %cst_28 {dimension_numbers = #tpu.dot_dimension_numbers<[2], [2], [1], [1], [0, 0, 0, 1, 1, 1], [0], [0]>} : vector<1x8x8xbf16>, vector<1x16x8xbf16>, vector<1x8x16xf32> -> vector<1x8x16xf32>
    "tpu.trace_stop"() : () -> ()
    %cst_29 = arith.constant dense<0xFF800000> : vector<1x8xf32>
    %59 = vector.multi_reduction <maximumf>, %58, %cst_29 [2] : vector<1x8x16xf32> to vector<1x8xf32>
    %60 = vector.shape_cast %59 : vector<1x8xf32> to vector<1x8x1xf32>
    %61 = vector.broadcast %60 : vector<1x8x1xf32> to vector<1x8x16xf32>
    %62 = arith.subf %58, %61 : vector<1x8x16xf32>
    %63 = math.exp %62 : vector<1x8x16xf32>
    %cst_30 = arith.constant dense<0.000000e+00> : vector<1x8xf32>
    %64 = vector.multi_reduction <add>, %63, %cst_30 [2] : vector<1x8x16xf32> to vector<1x8xf32>
    %65 = vector.shape_cast %64 : vector<1x8xf32> to vector<1x8x1xf32>
    %66 = tpu.reciprocal %65 {approx = true} : vector<1x8x1xf32> -> vector<1x8x1xf32>
    %67 = vector.broadcast %66 : vector<1x8x1xf32> to vector<1x8x16xf32>
    %68 = arith.mulf %63, %67 : vector<1x8x16xf32>
    %69 = arith.truncf %68 : vector<1x8x16xf32> to vector<1x8x16xbf16>
    "tpu.trace_start"() <{level = 10 : i32, message = "bls,bsd->bld"}> : () -> ()
    %cst_31 = arith.constant dense<0.000000e+00> : vector<1x8x8xf32>
    %70 = tpu.matmul %69, %57, %cst_31 {dimension_numbers = #tpu.dot_dimension_numbers<[2], [1], [1], [2], [0, 0, 0, 1, 1, 2], [0], [0]>} : vector<1x8x16xbf16>, vector<1x16x8xbf16>, vector<1x8x8xf32> -> vector<1x8x8xf32>
    "tpu.trace_stop"() : () -> ()
    %71 = arith.truncf %70 : vector<1x8x8xf32> to vector<1x8x8xbf16>
    %72 = vector.extract_strided_slice %35 {offsets = [0, 0, 16], sizes = [1, 8, 8], strides = [1, 1, 1]} : vector<1x8x32xbf16> to vector<1x8x8xbf16>
    %73 = vector.extract_strided_slice %36 {offsets = [0, 0, 16], sizes = [1, 16, 8], strides = [1, 1, 1]} : vector<1x16x32xbf16> to vector<1x16x8xbf16>
    %74 = vector.extract_strided_slice %37 {offsets = [0, 0, 16], sizes = [1, 16, 8], strides = [1, 1, 1]} : vector<1x16x32xbf16> to vector<1x16x8xbf16>
    "tpu.trace_start"() <{level = 10 : i32, message = "bld,bsd->bls"}> : () -> ()
    %cst_32 = arith.constant dense<0.000000e+00> : vector<1x8x16xf32>
    %75 = tpu.matmul %72, %73, %cst_32 {dimension_numbers = #tpu.dot_dimension_numbers<[2], [2], [1], [1], [0, 0, 0, 1, 1, 1], [0], [0]>} : vector<1x8x8xbf16>, vector<1x16x8xbf16>, vector<1x8x16xf32> -> vector<1x8x16xf32>
    "tpu.trace_stop"() : () -> ()
    %cst_33 = arith.constant dense<0xFF800000> : vector<1x8xf32>
    %76 = vector.multi_reduction <maximumf>, %75, %cst_33 [2] : vector<1x8x16xf32> to vector<1x8xf32>
    %77 = vector.shape_cast %76 : vector<1x8xf32> to vector<1x8x1xf32>
    %78 = vector.broadcast %77 : vector<1x8x1xf32> to vector<1x8x16xf32>
    %79 = arith.subf %75, %78 : vector<1x8x16xf32>
    %80 = math.exp %79 : vector<1x8x16xf32>
    %cst_34 = arith.constant dense<0.000000e+00> : vector<1x8xf32>
    %81 = vector.multi_reduction <add>, %80, %cst_34 [2] : vector<1x8x16xf32> to vector<1x8xf32>
    %82 = vector.shape_cast %81 : vector<1x8xf32> to vector<1x8x1xf32>
    %83 = tpu.reciprocal %82 {approx = true} : vector<1x8x1xf32> -> vector<1x8x1xf32>
    %84 = vector.broadcast %83 : vector<1x8x1xf32> to vector<1x8x16xf32>
    %85 = arith.mulf %80, %84 : vector<1x8x16xf32>
    %86 = arith.truncf %85 : vector<1x8x16xf32> to vector<1x8x16xbf16>
    "tpu.trace_start"() <{level = 10 : i32, message = "bls,bsd->bld"}> : () -> ()
    %cst_35 = arith.constant dense<0.000000e+00> : vector<1x8x8xf32>
    %87 = tpu.matmul %86, %74, %cst_35 {dimension_numbers = #tpu.dot_dimension_numbers<[2], [1], [1], [2], [0, 0, 0, 1, 1, 2], [0], [0]>} : vector<1x8x16xbf16>, vector<1x16x8xbf16>, vector<1x8x8xf32> -> vector<1x8x8xf32>
    "tpu.trace_stop"() : () -> ()
    %88 = arith.truncf %87 : vector<1x8x8xf32> to vector<1x8x8xbf16>
    %89 = vector.extract_strided_slice %35 {offsets = [0, 0, 24], sizes = [1, 8, 8], strides = [1, 1, 1]} : vector<1x8x32xbf16> to vector<1x8x8xbf16>
    %90 = vector.extract_strided_slice %36 {offsets = [0, 0, 24], sizes = [1, 16, 8], strides = [1, 1, 1]} : vector<1x16x32xbf16> to vector<1x16x8xbf16>
    %91 = vector.extract_strided_slice %37 {offsets = [0, 0, 24], sizes = [1, 16, 8], strides = [1, 1, 1]} : vector<1x16x32xbf16> to vector<1x16x8xbf16>
    "tpu.trace_start"() <{level = 10 : i32, message = "bld,bsd->bls"}> : () -> ()
    %cst_36 = arith.constant dense<0.000000e+00> : vector<1x8x16xf32>
    %92 = tpu.matmul %89, %90, %cst_36 {dimension_numbers = #tpu.dot_dimension_numbers<[2], [2], [1], [1], [0, 0, 0, 1, 1, 1], [0], [0]>} : vector<1x8x8xbf16>, vector<1x16x8xbf16>, vector<1x8x16xf32> -> vector<1x8x16xf32>
    "tpu.trace_stop"() : () -> ()
    %cst_37 = arith.constant dense<0xFF800000> : vector<1x8xf32>
    %93 = vector.multi_reduction <maximumf>, %92, %cst_37 [2] : vector<1x8x16xf32> to vector<1x8xf32>
    %94 = vector.shape_cast %93 : vector<1x8xf32> to vector<1x8x1xf32>
    %95 = vector.broadcast %94 : vector<1x8x1xf32> to vector<1x8x16xf32>
    %96 = arith.subf %92, %95 : vector<1x8x16xf32>
    %97 = math.exp %96 : vector<1x8x16xf32>
    %cst_38 = arith.constant dense<0.000000e+00> : vector<1x8xf32>
    %98 = vector.multi_reduction <add>, %97, %cst_38 [2] : vector<1x8x16xf32> to vector<1x8xf32>
    %99 = vector.shape_cast %98 : vector<1x8xf32> to vector<1x8x1xf32>
    %100 = tpu.reciprocal %99 {approx = true} : vector<1x8x1xf32> -> vector<1x8x1xf32>
    %101 = vector.broadcast %100 : vector<1x8x1xf32> to vector<1x8x16xf32>
    %102 = arith.mulf %97, %101 : vector<1x8x16xf32>
    %103 = arith.truncf %102 : vector<1x8x16xf32> to vector<1x8x16xbf16>
    "tpu.trace_start"() <{level = 10 : i32, message = "bls,bsd->bld"}> : () -> ()
    %cst_39 = arith.constant dense<0.000000e+00> : vector<1x8x8xf32>
    %104 = tpu.matmul %103, %91, %cst_39 {dimension_numbers = #tpu.dot_dimension_numbers<[2], [1], [1], [2], [0, 0, 0, 1, 1, 2], [0], [0]>} : vector<1x8x16xbf16>, vector<1x16x8xbf16>, vector<1x8x8xf32> -> vector<1x8x8xf32>
    "tpu.trace_stop"() : () -> ()
    %105 = arith.truncf %104 : vector<1x8x8xf32> to vector<1x8x8xbf16>
    %106 = tpu.concatenate %54, %71, %88, %105 in 2 : vector<1x8x8xbf16>, vector<1x8x8xbf16>, vector<1x8x8xbf16>, vector<1x8x8xbf16> -> vector<1x8x32xbf16>
    %107 = vector.shape_cast %106 : vector<1x8x32xbf16> to vector<8x32xbf16>
    %c3 = arith.constant 3 : index
    %c0_40 = arith.constant 0 : index
    %c0_41 = arith.constant 0 : index
    %108 = vector.load %arg5[%c3, %c0_40, %c0_41] : memref<4x32x32xbf16, #tpu.memory_space<vmem>>, vector<1x32x32xbf16>
    %109 = vector.shape_cast %108 : vector<1x32x32xbf16> to vector<32x32xbf16>
    %cst_42 = arith.constant dense<0.000000e+00> : vector<8x32xf32>
    %110 = tpu.matmul %107, %109, %cst_42 {dimension_numbers = #tpu.dot_dimension_numbers<[1], [0], [0], [1], [0, 0, 1, 1], [], []>} : vector<8x32xbf16>, vector<32x32xbf16>, vector<8x32xf32> -> vector<8x32xf32>
    %c3_43 = arith.constant 3 : index
    %c0_44 = arith.constant 0 : index
    %111 = vector.load %arg6[%c3_43, %c0_44] : memref<8x32xf32, #tpu.memory_space<vmem>>, vector<1x32xf32>
    %112 = vector.shape_cast %111 : vector<1x32xf32> to vector<32xf32>
    %113 = vector.shape_cast %112 : vector<32xf32> to vector<1x32xf32>
    %114 = vector.broadcast %113 : vector<1x32xf32> to vector<8x32xf32>
    %115 = arith.addf %110, %114 : vector<8x32xf32>
    %c0_45 = arith.constant 0 : index
    %c0_46 = arith.constant 0 : index
    %c0_47 = arith.constant 0 : index
    %116 = vector.load %arg1[%c0_45, %c0_46, %c0_47] : memref<1x8x32xf32, #tpu.memory_space<vmem>>, vector<1x8x32xf32>
    %117 = vector.shape_cast %116 : vector<1x8x32xf32> to vector<8x32xf32>
    %118 = arith.addf %117, %115 : vector<8x32xf32>
    %cst_48 = arith.constant dense<0.000000e+00> : vector<8xf32>
    %119 = vector.multi_reduction <add>, %118, %cst_48 [1] : vector<8x32xf32> to vector<8xf32>
    %120 = vector.shape_cast %119 : vector<8xf32> to vector<8x1xf32>
    %cst_49 = arith.constant 3.200000e+01 : f32
    %121 = vector.broadcast %cst_49 : f32 to vector<8x1xf32>
    %122 = arith.divf %120, %121 : vector<8x1xf32>
    %123 = vector.broadcast %122 : vector<8x1xf32> to vector<8x32xf32>
    %124 = arith.subf %118, %123 : vector<8x32xf32>
    %125 = arith.mulf %124, %124 : vector<8x32xf32>
    %cst_50 = arith.constant dense<0.000000e+00> : vector<8xf32>
    %126 = vector.multi_reduction <add>, %125, %cst_50 [1] : vector<8x32xf32> to vector<8xf32>
    %127 = vector.shape_cast %126 : vector<8xf32> to vector<8x1xf32>
    %cst_51 = arith.constant 3.200000e+01 : f32
    %128 = vector.broadcast %cst_51 : f32 to vector<8x1xf32>
    %129 = arith.divf %127, %128 : vector<8x1xf32>
    %130 = vector.broadcast %122 : vector<8x1xf32> to vector<8x32xf32>
    %131 = arith.subf %118, %130 : vector<8x32xf32>
    %cst_52 = arith.constant 9.99999974E-6 : f32
    %132 = vector.broadcast %cst_52 : f32 to vector<8x1xf32>
    %133 = arith.addf %129, %132 : vector<8x1xf32>
    %134 = math.rsqrt %133 : vector<8x1xf32>
    %135 = vector.broadcast %134 : vector<8x1xf32> to vector<8x32xf32>
    %136 = arith.mulf %131, %135 : vector<8x32xf32>
    %c4 = arith.constant 4 : index
    %c0_53 = arith.constant 0 : index
    %137 = vector.load %arg6[%c4, %c0_53] : memref<8x32xf32, #tpu.memory_space<vmem>>, vector<1x32xf32>
    %138 = vector.shape_cast %137 : vector<1x32xf32> to vector<32xf32>
    %139 = vector.shape_cast %138 : vector<32xf32> to vector<1x32xf32>
    %140 = vector.broadcast %139 : vector<1x32xf32> to vector<8x32xf32>
    %141 = arith.mulf %136, %140 : vector<8x32xf32>
    %c5 = arith.constant 5 : index
    %c0_54 = arith.constant 0 : index
    %142 = vector.load %arg6[%c5, %c0_54] : memref<8x32xf32, #tpu.memory_space<vmem>>, vector<1x32xf32>
    %143 = vector.shape_cast %142 : vector<1x32xf32> to vector<32xf32>
    %144 = vector.shape_cast %143 : vector<32xf32> to vector<1x32xf32>
    %145 = vector.broadcast %144 : vector<1x32xf32> to vector<8x32xf32>
    %146 = arith.addf %141, %145 : vector<8x32xf32>
    %147 = vector.shape_cast %146 : vector<8x32xf32> to vector<1x8x32xf32>
    %c0_55 = arith.constant 0 : index
    %c0_56 = arith.constant 0 : index
    %c0_57 = arith.constant 0 : index
    %148 = vector.load %arg7[%c0_55, %c0_56, %c0_57] : memref<1x8x32xf32, #tpu.memory_space<vmem>>, vector<1x8x32xf32>
    tpu.vector_store %arg7[%c0_55, %c0_56, %c0_57], %147 {strides = array<i32>} : memref<1x8x32xf32, #tpu.memory_space<vmem>>, vector<1x8x32xf32>,
    return
  }
  func.func @transform_0(%arg0: i32) -> (i32, i32, i32) {
    %c0_i32 = arith.constant 0 : i32
    %c0_i32_0 = arith.constant 0 : i32
    %c0_i32_1 = arith.constant 0 : i32
    return %arg0, %c0_i32, %c0_i32_0 : i32, i32, i32
  }
  func.func @transform_1(%arg0: i32) -> (i32, i32, i32) {
    %c0_i32 = arith.constant 0 : i32
    %c0_i32_0 = arith.constant 0 : i32
    %c0_i32_1 = arith.constant 0 : i32
    return %arg0, %c0_i32, %c0_i32_0 : i32, i32, i32
  }
  func.func @transform_2(%arg0: i32) -> (i32, i32, i32) {
    %c0_i32 = arith.constant 0 : i32
    %c0_i32_0 = arith.constant 0 : i32
    %c0_i32_1 = arith.constant 0 : i32
    return %arg0, %c0_i32, %c0_i32_0 : i32, i32, i32
  }
  func.func @transform_3(%arg0: i32) -> (i32, i32, i32) {
    %c0_i32 = arith.constant 0 : i32
    %c0_i32_0 = arith.constant 0 : i32
    %c0_i32_1 = arith.constant 0 : i32
    return %arg0, %c0_i32, %c0_i32_0 : i32, i32, i32
  }
  func.func @transform_4(%arg0: i32) -> (i32, i32, i32) {
    %c0_i32 = arith.constant 0 : i32
    %c0_i32_0 = arith.constant 0 : i32
    %c0_i32_1 = arith.constant 0 : i32
    %c0_i32_2 = arith.constant 0 : i32
    return %c0_i32, %c0_i32_0, %c0_i32_1 : i32, i32, i32
  }
  func.func @transform_5(%arg0: i32) -> (i32, i32) {
    %c0_i32 = arith.constant 0 : i32
    %c0_i32_0 = arith.constant 0 : i32
    %c0_i32_1 = arith.constant 0 : i32
    return %c0_i32, %c0_i32_0 : i32, i32
  }
  func.func @transform_6(%arg0: i32) -> (i32, i32, i32) {
    %c0_i32 = arith.constant 0 : i32
    %c0_i32_0 = arith.constant 0 : i32
    %c0_i32_1 = arith.constant 0 : i32
    return %arg0, %c0_i32, %c0_i32_0 : i32, i32, i32
  }
}

</mosaic_0001>

<bundles_post_ra>
// kernel: tpu_custom_call.1
= control target key start
LH: loop header
LB: loop body
LE: loop exit
PB: predicated region body
PF: predicated region fallthrough
CT: control target
= control target key end

     0   :  { %s1857_s0 = inlined_call_operand.hbm [shape: f32[2,8,32], index: 0, kind: input, shape index: {}]   ;;  %s1858_s1 = inlined_call_operand.hbm [shape: bf16[2,8,32], index: 1, kind: input, shape index: {}]   ;;  %s1859_s2 = inlined_call_operand.hbm [shape: bf16[2,16,32], index: 2, kind: input, shape index: {}]   ;;  %s1860_s3 = inlined_call_operand.hbm [shape: bf16[2,16,32], index: 3, kind: input, shape index: {}]   ;;  %s1861_s4 = inlined_call_operand.hbm [shape: bf16[4,32,32], index: 4, kind: input, shape index: {}]   ;;  %s1862_s5 = inlined_call_operand.hbm [shape: f32[8,32], index: 5, kind: input, shape index: {}]   ;;  %s1863_s6 = inlined_call_operand.hbm [shape: f32[2,8,32], index: 6, kind: output, shape index: {}]  }
   0x1   :  { %1871 = sst [smem:[#allocation22_spill]] %s1857_s0 }
   0x2   :  { %1872 = sst [smem:[#allocation23_spill]] %s1858_s1 }
   0x3   :  { %1873 = sst [smem:[#allocation24_spill]] %s1861_s4 }
   0x4   :  { %1874 = sst [smem:[#allocation25_spill]] %s1862_s5 }
   0x5   :  { %11 = vsyncpa [#allocation3], 0 }
   0x6   :  { %13 = vsyncpa [#allocation3 + $0x1], 0 }
   0x7   :  { %14 = vsyncpa [#allocation6], 0 }
   0x8   :  { %16 = vsyncpa [#allocation6 + $0x1], 0 }
   0x9   :  { %17 = vsyncpa [#allocation9], 0 }
   0xa   :  { %19 = vsyncpa [#allocation9 + $0x1], 0 }
   0xb   :  { %20 = vsyncpa [#allocation12], 0 }
   0xc   :  { %21 = vsyncpa [#allocation4], 0 }
   0xd   :  { %23 = vsyncpa [#allocation4 + $0x1], 0  ;;  %s1562_s21 = smov 0   ;;  %s1564_s22 = smov 0  }
   0xe   :  { %s1566_s23 = smov 0   ;;  %s1568_s24 = smov 0  }
   0xf LB: > { %1875 = sst [smem:[#allocation20_spill]] %s1510_s23  ;;  %s1586_s28 = sadd.s32 4294967295, %s1514_s24   ;;  %s1514_s24 = sphi %s1568_s24, %s1899_s24   ;;  %s1510_s23 = sphi %s1566_s23, %s1896_s23   ;;  %s1506_s22 = sphi %s1564_s22, %s1898_s22   ;;  %s1502_s21 = sphi %s1562_s21, %s1897_s21  }
  0x10   : > { %s1876_s4 = sld [smem:[#allocation24_spill]]  ;;  %p1045_p0 = scmp.ge.s32.totalorder %s1514_s24, 1 }
  0x11   : > { %p1868_p1 = scmp.eq.s32.totalorder %s1586_s28, 0  ;;  %p206_p2 = scmp.lt.s32.totalorder %s1514_s24, 3 }
  0x12   : > { %s1516_s30 = smov [#allocation10]   ;;  %s1864_s9 = smov 64  }
  0x13   : > { %p1591_p3 = pnand %p1045_p0, %p206_p2  ;;  %s219_s7 = sshll.u32 %s1516_s30, 4  ;;  %s220_s7 = int_to_ptr.vmem [resolvable:$true] %s219_s7 }
  0x14   : > { %s1866_s10 = smov 4   ;;  %s1044_s11 = sadd.s32 4294967294, %s1514_s24  }
  0x15   : > { %p1153_p4 = pneg %p1591_p3  ;;  %s1611_s12 = sadd.s32 1, %s1514_s24  }
  0x16   : > { %s217_s27 = sshll.u32 %s1876_s4, 4  ;;  %s36_s13 = sadd.s32 1, %s1510_s23  ;;  %s218_s27 = int_to_ptr.hbm [resolvable:$true] %s217_s27 }
  0x17   : > { %p1600_p6 = pnand %p1153_p4, %p1868_p1  ;;  %s33_s14 = ssub.s32 %s1514_s24, %s1611_s12 }
  0x18   : > { %p43_p7 = scmp.ne.s32.totalorder %s1510_s23, %s1506_s22  ;;  %p34_p8 = scmp.eq.s32.totalorder %s33_s14, 0 }
  0x19   : > { %1156 = dma.hbm_to_vmem [thread:$0]  (!%p1600_p6), %s218_s27, 1024, %s220_s7, [#allocation9], %s1864_s9, %s1864_s9, %s1866_s10  }
  0x1a   : > { %p44_p9 = scmp.eq.s32.totalorder %s1514_s24, 0  ;;  %p49_p10 = scmp.ne.s32.totalorder %s1506_s22, %s1502_s21 }
  0x1b   : > { %p193_p11 = scmp.eq.s32.totalorder %s1586_s28, 1  ;;  %p199_p2 = scmp.eq.s32.totalorder %s1044_s11, 1 }
  0x1c   : > { %s1623_s15 = scalar_select %p34_p8, %s1510_s23, %s36_s13  }
  0x1d   : > { %p45_p12 = por %p44_p9, %p43_p7  ;;  %p1627_p13 = por %p1868_p1, %p49_p10 }
  0x1e   : > { %1879 = sst [smem:[#allocation21_spill]] %s1623_s15  ;;  %p1631_p0 = por %p193_p11, %p43_p7 }
  0x1f   : > { %p1179_p4 = scmp.lt.s32.totalorder %s1514_s24, 2  ;;  %s1637_s18 = sand.u32 1, %s1510_s23  }
  0x20   : > { %p1639_p5 = por %p199_p2, %p49_p10  ;;  %s1869_s20 = sand.u32 1, %s1514_s24  }
  0x21   : > { %p1644_p8 = pnand %p1179_p4, %p45_p12  ;;  %s1051_s26 = sshll.u32 %s1637_s18, 2 }
  0x22   : > { %s1052_s27 = sshll.u32 %s1514_s24, 2  ;;  %s1884_s1 = sld [smem:[#allocation23_spill]] }
  0x23   : > { %s268_s13 = scalar_lea.vmem [#allocation5], %s1051_s26  ;;  %s1655_s10 = scalar_lea.sflag [#allocation6], %s1869_s20 }
  0x24   : > { %s276_s14 = sshll.u32 %s268_s13, 4  ;;  %p1286_p9 = pneg %p1644_p8  ;;  %s277_s14 = int_to_ptr.vmem [resolvable:$true] %s276_s14 }
  0x28   : > { %s272_s11 = scalar_lea.hbm %s1884_s1, %s1052_s27  ;;  %s1289_s26 = scalar_lea.hbm %s1884_s1, 8 }
  0x29   : > { %s274_s9 = sshll.u32 %s272_s11, 4  ;;  %s275_s9 = int_to_ptr.hbm [resolvable:$true] %s274_s9 }
  0x2a   : > { %s1282_s4 = sshra.s32 %s275_s9, 4  ;;  %s1283_s4 = int_to_ptr.hbm [resolvable:$true] %s1282_s4 }
  0x2b   : > { %s1284_s15 = scalar_lea.hbm %s1283_s4, 4  ;;  %p1290_p12 = scmp.lt.s32.totalorder %s1283_s4, %s1884_s1 }
  0x2c   : > { %p1285_p7 = scmp.ne.s32.totalorder %s1283_s4, %s1284_s15  ;;  %p1291_p2 = scmp.lt.s32.totalorder %s1289_s26, %s1284_s15 }
  0x2e   : > { %p1287_p10 = pnand %p1286_p9, %p1285_p7  ;;  %p1292_p4 = por %p1291_p2, %p1290_p12 }
  0x30   : > { %p1288_p11 = pneg %p1287_p10 }
  0x32   : > { %p1293_p1 = pnand %p1292_p4, %p1288_p11 }
  0x34   : > { %1296 = shalt.err (!%p1293_p1)
}
  0x35   : > { %1166 = dma.hbm_to_vmem [thread:$0]  (!%p1644_p8), %s275_s9, 64, %s277_s14, %s1655_s10  }
  0x36   : > { %s1885_s5 = sld [smem:[#allocation25_spill]]  ;;  %s1519_s27 = smov [#allocation11]  }
  0x37   : > { %s234_s7 = sshll.u32 %s1519_s27, 4  ;;  %s1677_s4 = sshll.u32 %s1637_s18, 3  ;;  %s235_s7 = int_to_ptr.vmem [resolvable:$true] %s234_s7 }
  0x38   : > { %s1050_s15 = sshll.u32 %s1514_s24, 3  ;;  %s1886_s0 = sld [smem:[#allocation22_spill]] }
  0x39   : > { %s249_s14 = scalar_lea.vmem [#allocation2], %s1677_s4  ;;  %s246_s20 = scalar_lea.sflag [#allocation3], %s1637_s18 }
  0x3a   : > { %s257_s23 = sshll.u32 %s249_s14, 4  ;;  %s258_s23 = int_to_ptr.vmem [resolvable:$true] %s257_s23 }
  0x3c   : > { %s232_s30 = sshll.u32 %s1885_s5, 4  ;;  %s233_s30 = int_to_ptr.hbm [resolvable:$true] %s232_s30 }
  0x3d   : > { %1159 = dma.hbm_to_vmem [thread:$0]  (!%p1600_p6), %s233_s30, 128, %s235_s7, [#allocation12]  }
  0x3e   : > { %s253_s1 = scalar_lea.hbm %s1886_s0, %s1050_s15  ;;  %s1349_s7 = scalar_lea.hbm %s1886_s0, 16 }
  0x3f   : > { %s255_s9 = sshll.u32 %s253_s1, 4  ;;  %s256_s9 = int_to_ptr.hbm [resolvable:$true] %s255_s9 }
  0x40   : > { %s1342_s13 = sshra.s32 %s256_s9, 4  ;;  %s1343_s13 = int_to_ptr.hbm [resolvable:$true] %s1342_s13 }
  0x41   : > { %s1344_s27 = scalar_lea.hbm %s1343_s13, 8  ;;  %p1350_p10 = scmp.lt.s32.totalorder %s1343_s13, %s1886_s0 }
  0x42   : > { %p1345_p1 = scmp.ne.s32.totalorder %s1343_s13, %s1344_s27  ;;  %p1351_p11 = scmp.lt.s32.totalorder %s1349_s7, %s1344_s27 }
  0x44   : > { %p1347_p6 = pnand %p1345_p1, %p1286_p9  ;;  %p1352_p12 = por %p1351_p11, %p1350_p10 }
  0x46   : > { %p1348_p7 = pneg %p1347_p6 }
  0x48   : > { %p1353_p2 = pnand %p1352_p12, %p1348_p7 }
  0x4a   : > { %1356 = shalt.err (!%p1353_p2)
}
  0x4b   : > { %1163 = dma.hbm_to_vmem [thread:$0]  (!%p1644_p8), %s256_s9, 128, %s258_s23, %s246_s20  }
  0x4c   : > { %s292_s14 = scalar_lea.hbm %s1859_s2, %s1050_s15  ;;  %s287_s30 = scalar_lea.vmem [#allocation7], %s1677_s4 }
  0x4d   : > { %s293_s8 = sshll.u32 %s292_s14, 4  ;;  %s295_s5 = sshll.u32 %s287_s30, 4  ;;  %s294_s8 = int_to_ptr.hbm [resolvable:$true] %s293_s8  ;;  %s296_s5 = int_to_ptr.vmem [resolvable:$true] %s295_s5 }
  0x4e   : > { %s314_s7 = scalar_lea.hbm %s1860_s3, %s1050_s15  ;;  %s309_s11 = scalar_lea.vmem [#allocation8], %s1677_s4 }
  0x4f   : > { %s1703_s26 = sshll.u32 %s314_s7, 4  ;;  %s1706_s0 = sshll.u32 %s309_s11, 4  ;;  %s316_s26 = int_to_ptr.hbm [resolvable:$true] %s1703_s26  ;;  %s318_s0 = int_to_ptr.vmem [resolvable:$true] %s1706_s0 }
  0x50   : > { %s1372_s23 = sshra.s32 %s294_s8, 4  ;;  %s1379_s15 = scalar_lea.hbm %s1859_s2, 16  ;;  %s1373_s23 = int_to_ptr.hbm [resolvable:$true] %s1372_s23 }
  0x51   : > { %s1374_s9 = scalar_lea.hbm %s1373_s23, 8  ;;  %p1380_p7 = scmp.lt.s32.totalorder %s1373_s23, %s1859_s2 }
  0x52   : > { %p1375_p4 = scmp.ne.s32.totalorder %s1373_s23, %s1374_s9  ;;  %p1381_p10 = scmp.lt.s32.totalorder %s1379_s15, %s1374_s9 }
  0x54   : > { %p1377_p1 = pnand %p1375_p4, %p1286_p9  ;;  %p1382_p11 = por %p1381_p10, %p1380_p7 }
  0x56   : > { %p1378_p6 = pneg %p1377_p1 }
  0x58   : > { %p1383_p12 = pnand %p1382_p11, %p1378_p6 }
  0x5a   : > { %1386 = shalt.err (!%p1383_p12)
}
  0x5b   : > { %s1887_s4 = smov 4   ;;  %s1888_s30 = smov 64  }
  0x5c   : > { %1169 = dma.hbm_to_vmem [thread:$0]  (!%p1644_p8), %s294_s8, 128, %s296_s5, %s1655_s10, %s1888_s30, %s1888_s30, %s1887_s4  }
  0x5d   : > { %s1889_s13 = sand.u32 1, %s1514_s24   ;;  %s1402_s7 = sshra.s32 %s316_s26, 4  ;;  %s1403_s7 = int_to_ptr.hbm [resolvable:$true] %s1402_s7 }
  0x5e   : > { %s306_s27 = scalar_lea.sflag [#allocation9], %s1889_s13  ;;  %s1404_s11 = scalar_lea.hbm %s1403_s7, 8 }
  0x5f   : > { %p1405_p2 = scmp.ne.s32.totalorder %s1403_s7, %s1404_s11  ;;  %s1409_s20 = scalar_lea.hbm %s1860_s3, 16 }
  0x60   : > { %p1410_p6 = scmp.lt.s32.totalorder %s1403_s7, %s1860_s3  ;;  %p1411_p7 = scmp.lt.s32.totalorder %s1409_s20, %s1404_s11 }
  0x61   : > { %p1407_p4 = pnand %p1405_p2, %p1286_p9 }
  0x62   : > { %p1412_p10 = por %p1411_p7, %p1410_p6 }
  0x63   : > { %p1408_p1 = pneg %p1407_p4 }
  0x65   : > { %p1413_p11 = pnand %p1412_p10, %p1408_p1 }
  0x67   : > { %1416 = shalt.err (!%p1413_p11)
}
  0x68   : > { %1172 = dma.hbm_to_vmem [thread:$0]  (!%p1644_p8), %s316_s26, 128, %s318_s0, %s306_s27, %s1888_s30, %s1888_s30, %s1887_s4  }
  0x69   : > { %329 = sbr.rel (%p1591_p3) target bundleno = 1474 (0x5c2), region = 44  ;;  %s1750_s5 = sand.u32 (!%p1591_p3), 1, %s1506_s22  }
  0x6a   : > { %s1753_s10 = sshll.u32 (!%p1591_p3), %s1750_s5, 3  ;;  %s332_s25 = scalar_lea.sflag (!%p1591_p3), [#allocation3], %s1750_s5 }
  0x6b   : > { %s335_s8 = scalar_lea.vmem (!%p1591_p3), [#allocation2], %s1753_s10 }
  0x6e   : > { %1477 = dma.done.wait (%p1627_p13), %s332_s25, 128  }
  0x6f   : > { %1479 = vsyncadd (%p1627_p13), %s332_s25, 4294967168  ;;  %s341_s0 = sand.u32 1, %s1586_s28   ;;  %s1061_s29 = sshll.u32 %s1750_s5, 2 }
  0x70   : > { %s342_s26 = scalar_lea.sflag [#allocation6], %s341_s0  ;;  %s345_s18 = scalar_lea.vmem [#allocation5], %s1061_s29 }
  0x71   : > { %1481 = dma.done.wait (%p1627_p13), %s342_s26, 192  }
  0x72   : > { %1483 = vsyncadd (%p1627_p13), %s342_s26, 4294967104  ;;  %s355_s14 = scalar_lea.vmem [#allocation7], %s1753_s10  ;;  %s362_s4 = scalar_lea.sflag [#allocation9], %s341_s0 }
  0x73   : > { %s365_s30 = scalar_lea.vmem [#allocation8], %s1753_s10 }
  0x74   : > { %1485 = dma.done.wait (%p1627_p13), %s362_s4, 128  }
  0x75   : > { %1487 = vsyncadd (%p1627_p13), %s362_s4, 4294967168  ;;  %p1890_p3 = scmp.eq.s32.totalorder %s1586_s28, 0 }
  0x77   : > { %1489 = dma.done.wait (%p1890_p3), [#allocation9], 1024   ;;  %p1891_p8 = pmov %p1890_p3 }
  0x78   : > { %p1892_p9 = pmov %p1890_p3 }
  0x79   : > { %1491 = vsyncadd (%p1891_p8), [#allocation9], 4294966272 }
  0x7a   : > { %1493 = dma.done.wait (%p1892_p9), [#allocation12], 128   ;;  %p1893_p12 = pmov %p1890_p3 }
  0x7b   : > { %v1130_v0 = vld [vmem:[#allocation10 + $0x18] sm:$0xff]  ;;  %v1128_v1 = vld [vmem:[#allocation10 + $0x8] sm:$0xff]  ;;  %v1129_v2 = vld [vmem:[#allocation10 + $0x10] sm:$0xff]  ;;  %vm444_vm0 = vcmask 261120   ;;  %s1520_s16 = smov 112   ;;  %vm554_vm1 = vcmask 64512  }
  0x7c   : > { %1495 = vsyncadd (%p1893_p12), [#allocation12], 4294967168  ;;  %496 = vmatpush.bf16.msra.mxu1 %v1130_v0  ;;  %454 = vmatpush.bf16.msra.mxu0 %v1128_v1  ;;  %v1127_v3 = vld [vmem:[#allocation10] sm:$0xff]  ;;  %v421_v5 = vld [vmem:[%s345_s18] sm:$0xf]  ;;  %s1521_s13 = smov 120  }
  0x7d   : > { %v1125_v4 = vld [vmem:[%s355_s14] sm:$0xff]  ;;  %s1522_s27 = smov 104   ;;  %v1126_v32 = vld [vmem:[%s365_s30] sm:$0xff]  ;;  %vm574_vm2 = vcmask 130048   ;;  %s1523_s7 = smov 8   ;;  %vm798_vm3 = vcmask 195584  }
  0x7e   : > { %v1227_v6 = vld [vmem:[#allocation11] ss:$0 sm:$0xff]  ;;  %v1226_v9 = vld [vmem:[#allocation11 + $0x1] ss:$0 sm:$0xff]  ;;  %v1132_v29 = vld [vmem:[#allocation10 + $0x28] sm:$0xff]  ;;  %s1524_s11 = smov 24  }
  0x7f   : > { %539 = vmatpush.bf16.msra.mxu2 %v1132_v29  ;;  %v1131_v30 = vld [vmem:[#allocation10 + $0x20] sm:$0xff]  ;;  %s1525_s23 = smov 16   ;;  %s1120_s9 = sshll.u32 %s1586_s28, 3 }
  0x80   : > { %497 = vmatpush.bf16.msra.mxu1 %v1129_v2  ;;  %455 = vmatpush.bf16.msra.mxu0 %v1127_v3  ;;  %v1228_v55 = vld [vmem:[#allocation11 + $0x2] ss:$0 sm:$0xff]  ;;  %s884_s15 = scalar_lea.hbm %s1863_s6, %s1120_s9  ;;  %s419_s25 = scalar_lea.vmem [#allocation13], %s1753_s10 }
  0x81   : > { %s888_s0 = sshll.u32 %s884_s15, 4  ;;  %s874_s28 = scalar_lea.sflag [#allocation4], %s1750_s5  ;;  %s889_s0 = int_to_ptr.hbm [resolvable:$true] %s888_s0 }
  0x82   : > { %s1446_s29 = sshra.s32 %s889_s0, 4  ;;  %s1452_s10 = scalar_lea.hbm %s1863_s6, 16  ;;  %s1447_s29 = int_to_ptr.hbm [resolvable:$true] %s1446_s29 }
  0x83   : > { %1088 = vmatmul.msk.bf16.vlgmr.msra.gmra.mxu1 %vm444_vm0, %v1125_v4  ;;  %1075 = vmatmul.msk.bf16.vlgmr.msra.gmra.mxu0 %vm444_vm0, %v421_v5  ;;  %s1448_s26 = scalar_lea.hbm %s1447_s29, 8  ;;  %p1453_p1 = scmp.lt.s32.totalorder %s1447_s29, %s1863_s6 }
  0x84   : > { %540 = vmatpush.bf16.msra.mxu2 %v1131_v30  ;;  %p1449_p13 = scmp.ne.s32.totalorder %s1447_s29, %s1448_s26  ;;  %p1454_p6 = scmp.lt.s32.totalorder %s1452_s10, %s1448_s26 }
  0x86   : > { %p1450_p2 = pnand %p1449_p13, %p1631_p0  ;;  %p1455_p7 = por %p1454_p6, %p1453_p1 }
  0x87   : > { %1101 = vmatmul.msk.bf16.vlgmr.msra.gmra.mxu2 %vm444_vm0, %v1126_v32 }
  0x88   : > { %p1451_p4 = pneg %p1450_p2 }
  0x8a   : > { %p1456_p10 = pnand %p1455_p7, %p1451_p4 }
 0x100   : > { %v499_v7 = vpop.f32.mrf.mxu1  ;;  %v457_v8 = vpop.f32.mrf.mxu0 }
 0x101   : > { %v458_v10 = vadd.f32 %v1227_v6, %v457_v8  ;;  %v500_v12 = vadd.f32 %v1226_v9, %v499_v7 }
 0x103   : > { %v461_v11 = vmul.f32 0.35355338, %v458_v10  ;;  %v504_v17 = vpack.c.bf16 %v500_v12, %v500_v12 }
 0x105   : > { %v462_v13 = vpack.c.bf16 %v461_v11, %v461_v11  ;;  %v551_v21 = vunpack.c.l.b16 %v504_v17 }
 0x107   : > { %v611_v14 = vunpack.c.l.b16 %v462_v13 }
 0x108   : > { %v501_v15 = vpop.f32.mrf.mxu1  ;;  %v459_v16 = vpop.f32.mrf.mxu0 }
 0x109   : > { %v502_v18 = vadd.f32 %v1226_v9, %v501_v15  ;;  %v612_v19 = vpack.c.b16 %v611_v14, %v611_v14 }
 0x10a   : > { %v542_v54 = vpop.f32.mrf.mxu2 }
 0x10b   : > { %v505_v20 = vpack.c.bf16 %v502_v18, %v502_v18  ;;  %668 = vrot.lane.b32.xlu2 %v612_v19, %s1520_s16  ;;  %v543_v56 = vadd.f32 %v1228_v55, %v542_v54 }
 0x10d   : > { %v552_v22 = vunpack.c.l.b16 %v505_v20  ;;  %v547_v57 = vpack.c.bf16 %v543_v56, %v543_v56 }
 0x10f   : > { %v553_v23 = vpack.c.b16 %v552_v22, %v551_v21  ;;  %v589_v60 = vunpack.c.l.b16 %v547_v57 }
 0x111   : > { %670 = vrot.lane.b32.xlu1 %v553_v23, %s1520_s16  ;;  %615 = vrot.lane.b32.xlu0 %v553_v23, %s1521_s13  ;;  %v559_v24 = vsel %vm554_vm1, %v553_v23, 0 }
 0x112   : > { %568 = vmatpush.bf16.xpose.msra.mxu3 %v559_v24  ;;  %v544_v58 = vpop.f32.mrf.mxu2 }
 0x113   : > { %723 = vrot.lane.b32.xlu2 %v612_v19, %s1522_s27  ;;  %v545_v59 = vadd.f32 %v1228_v55, %v544_v58 }
 0x115   : > { %v548_v61 = vpack.c.bf16 %v545_v59, %v545_v59 }
 0x117   : > { %v590_v62 = vunpack.c.l.b16 %v548_v61 }
 0x119   : > { %725 = vrot.lane.b32.xlu1 %v553_v23, %s1522_s27  ;;  %613 = vrot.lane.b32.xlu0 %v612_v19, %s1521_s13  ;;  %v591_v63 = vpack.c.b16 %v590_v62, %v589_v60  ;;  %v1229_v60 = vld [vmem:[#allocation11 + $0x3] ss:$0 sm:$0xff]  ;;  %v835_v62 = vld [vmem:[%s335_s8] sm:$0xff]  ;;  %s886_s8 = sshll.u32 %s419_s25, 4  ;;  %s887_s8 = int_to_ptr.vmem [resolvable:$true] %s886_s8 }
 0x11a   : > { %1102 = vmatmul.msk.bf16.vlgmr.msra.gmra.mxu3 %vm554_vm1, %v462_v13 }
 0x11b   : > { %603 = vmatpush.bf16.msrb.mxu0 %v591_v63 }
 0x165   : > { %v669_v31 = vpop.permute.xlu2 %668 }
 0x16d   : > { %v724_v36 = vpop.permute.xlu2 %723 }
 0x183   : > { %v671_v25 = vpop.permute.xlu1 %670  ;;  %v616_v26 = vpop.permute.xlu0 %615 }
 0x184   : > { %v621_v27 = vsel %vm554_vm1, %v616_v26, 0  ;;  %v676_v28 = vsel %vm554_vm1, %v671_v25, 0 }
 0x185   : > { %630 = vmatpush.bf16.xpose.msrb.mxu1 %v621_v27  ;;  %685 = vmatpush.bf16.xpose.msrb.mxu3 %v676_v28 }
 0x18b   : > { %v726_v33 = vpop.permute.xlu1 %725  ;;  %v614_v34 = vpop.permute.xlu0 %613 }
 0x18c   : > { %v731_v35 = vsel %vm554_vm1, %v726_v33, 0  ;;  %1104 = vmatmul.msk.bf16.vlgmr.msrb.gmra.mxu1 %vm554_vm1, %v614_v34  ;;  %1106 = vmatmul.msk.bf16.vlgmr.msrb.gmra.mxu3 %vm554_vm1, %v669_v31 }
 0x18d   : > { %740 = vmatpush.bf16.xpose.msra.mxu1 %v731_v35 }
 0x19c   : > { %1108 = vmatmul.msk.bf16.vlgmr.msra.gmra.mxu1 %vm554_vm1, %v724_v36 }
 0x19d   : > { %v570_v37 = vpop.f32.mrf.mxu3 }
 0x19e   : > { %v575_v38 = vsel %vm574_vm2, %v570_v37, -inf }
 0x19f   : > { %576 = vmax.xlane.f32.xlu1 %v575_v38 }
 0x1a5   : > { %v572_v39 = vpop.f32.mrf.mxu3 }
 0x209   : > { %v632_v40 = vpop.f32.mrf.mxu1 }
 0x20a   : > { %v636_v41 = vsel %vm574_vm2, %v632_v40, -inf }
 0x20b   : > { %637 = vmax.xlane.f32.xlu0 %v636_v41 }
 0x20f   : > { %v687_v42 = vpop.f32.mrf.mxu3 }
 0x210   : > { %v691_v53 = vsel %vm574_vm2, %v687_v42, -inf }
 0x211   : > { %v634_v43 = vpop.f32.mrf.mxu1 }
 0x212   : > { %v577_v44 = vpop.xlane.xlu1 %576 }
 0x213   : > { %v578_v45 = vsub.f32 %v570_v37, %v577_v44 }
 0x215   : > { %v579_v46 = vmul.f32 1.442695, %v578_v45 }
 0x217   : > { %1232 = vpow2.f32 %v579_v46  ;;  %v689_v47 = vpop.f32.mrf.mxu3 }
 0x219   : > { %v742_v48 = vpop.f32.mrf.mxu1 }
 0x21a   : > { %v746_v49 = vsel %vm574_vm2, %v742_v48, -inf }
 0x21b   : > { %747 = vmax.xlane.f32.xlu2 %v746_v49 }
 0x21d   : > { %v1233_v50 = vpop.eup %1232 }
 0x21e   : > { %v581_v51 = vsel %vm574_vm2, %v1233_v50, 0.0 }
 0x21f   : > { %582 = vadd.xlane.f32.xlu1 %v581_v51  ;;  %v1134_v51 = vld [vmem:[#allocation10 + $0x38] sm:$0xff] }
 0x220   : > { %828 = vmatpush.bf16.msra.mxu3 %v1134_v51 }
 0x221   : > { %v744_v52 = vpop.f32.mrf.mxu1 }
 0x222   : > { %v1133_v52 = vld [vmem:[#allocation10 + $0x30] sm:$0xff] }
 0x223   : > { %692 = vmax.xlane.f32.xlu2 %v691_v53 }
 0x224   : > { %829 = vmatpush.bf16.msra.mxu3 %v1133_v52 }
 0x23b   : > { %648 = vrot.lane.b32.xlu2 %v591_v63, %s1521_s13 }
 0x27e   : > { %v638_v0 = vpop.xlane.xlu0 %637 }
 0x27f   : > { %v639_v1 = vsub.f32 %v632_v40, %v638_v0 }
 0x281   : > { %v640_v2 = vmul.f32 1.442695, %v639_v1 }
 0x283   : > { %1234 = vpow2.f32 %v640_v2 }
 0x289   : > { %v1235_v3 = vpop.eup %1234 }
 0x28a   : > { %v642_v4 = vsel %vm574_vm2, %v1235_v3, 0.0 }
 0x28b   : > { %643 = vadd.xlane.f32.xlu0 %v642_v4 }
 0x28e   : > { %v748_v5 = vpop.xlane.xlu2 %747 }
 0x28f   : > { %v749_v6 = vsub.f32 %v742_v48, %v748_v5 }
 0x291   : > { %v750_v7 = vmul.f32 1.442695, %v749_v6 }
 0x292   : > { %v583_v8 = vpop.xlane.xlu1 %582 }
 0x293   : > { %1236 = vpow2.f32 %v750_v7 }
 0x294   : > { %1238 = vrcp.f32 %v583_v8 }
 0x296   : > { %v693_v9 = vpop.xlane.xlu2 %692 }
 0x297   : > { %v694_v10 = vsub.f32 %v687_v42, %v693_v9 }
 0x299   : > { %v1237_v11 = vpop.eup %1236  ;;  %v695_v12 = vmul.f32 1.442695, %v694_v10 }
 0x29a   : > { %v1239_v13 = vpop.eup %1238  ;;  %v752_v14 = vsel %vm574_vm2, %v1237_v11, 0.0 }
 0x29b   : > { %v585_v15 = vmul.f32 %v1239_v13, %v1233_v50  ;;  %1240 = vpow2.f32 %v695_v12  ;;  %753 = vadd.xlane.f32.xlu0 %v752_v14 }
 0x29d   : > { %v586_v16 = vpack.c.bf16 %v585_v15, %v585_v15 }
 0x29e   : > { %v649_v19 = vpop.permute.xlu2 %648 }
 0x29f   : > { %1103 = vmatmul.msk.bf16.vlgmr.msrb.gmra.mxu0 %vm574_vm2, %v586_v16  ;;  %661 = vmatpush.bf16.msrb.mxu2 %v649_v19 }
 0x2a1   : > { %v1241_v17 = vpop.eup %1240 }
 0x2a2   : > { %v697_v18 = vsel %vm574_vm2, %v1241_v17, 0.0 }
 0x2a3   : > { %698 = vadd.xlane.f32.xlu1 %v697_v18 }
 0x2af   : > { %758 = vrot.lane.b32.xlu0 %v591_v63, %s1522_s27 }
 0x2bc   : > { %703 = vrot.lane.b32.xlu1 %v591_v63, %s1520_s16 }
 0x2fe   : > { %v644_v20 = vpop.xlane.xlu0 %643 }
 0x2ff   : > { %1242 = vrcp.f32 %v644_v20 }
 0x305   : > { %v1243_v21 = vpop.eup %1242 }
 0x306   : > { %v646_v22 = vmul.f32 %v1243_v21, %v1235_v3  ;;  %v1526_v3 = vmov 32.0  }
 0x308   : > { %v647_v23 = vpack.c.bf16 %v646_v22, %v646_v22 }
 0x30a   : > { %1105 = vmatmul.msk.bf16.vlgmr.msrb.gmra.mxu2 %vm574_vm2, %v647_v23 }
 0x30e   : > { %v754_v24 = vpop.xlane.xlu0 %753 }
 0x30f   : > { %1244 = vrcp.f32 %v754_v24  ;;  %v1230_v24 = vld [vmem:[#allocation11 + $0x4] ss:$0 sm:$0xff] }
 0x315   : > { %v1245_v25 = vpop.eup %1244 }
 0x316   : > { %v756_v27 = vmul.f32 %v1245_v25, %v1237_v11  ;;  %v699_v28 = vpop.xlane.xlu1 %698 }
 0x317   : > { %1246 = vrcp.f32 %v699_v28 }
 0x318   : > { %v757_v30 = vpack.c.bf16 %v756_v27, %v756_v27  ;;  %1248 = vrcp.f32 %v1526_v3  ;;  %v1231_v27 = vld [vmem:[#allocation11 + $0x5] ss:$0 sm:$0xff] }
 0x31c   : > { %v605_v26 = vpop.f32.mrf.mxu0 }
 0x31d   : > { %v1247_v32 = vpop.eup %1246  ;;  %v609_v54 = vpack.c.bf16 %v605_v26, %v605_v26 }
 0x31e   : > { %v701_v33 = vmul.f32 %v1247_v32, %v1241_v17  ;;  %v1249_v4 = vpop.eup %1248 }
 0x31f   : > { %v841_v5 = vmul.f32 32.0, %v1249_v4  ;;  %vm845_vm4 = vweird.f32 %v1249_v4 }
 0x320   : > { %v702_v35 = vpack.c.bf16 %v701_v33, %v701_v33 }
 0x321   : > { %v759_v29 = vpop.permute.xlu0 %758  ;;  %v842_v6 = vsub.f32 1.0, %v841_v5 }
 0x322   : > { %771 = vmatpush.bf16.msra.mxu2 %v759_v29 }
 0x323   : > { %v843_v7 = vmul.f32 %v1249_v4, %v842_v6 }
 0x324   : > { %v607_v31 = vpop.f32.mrf.mxu0 }
 0x325   : > { %1109 = vmatmul.msk.bf16.vlgmr.msra.gmra.mxu2 %vm574_vm2, %v757_v30  ;;  %v844_v8 = vadd.f32 %v1249_v4, %v843_v7 }
 0x327   : > { %v846_v9 = vsel %vm845_vm4, %v1249_v4, %v844_v8 }
 0x32e   : > { %v704_v34 = vpop.permute.xlu1 %703 }
 0x32f   : > { %716 = vmatpush.bf16.msra.mxu0 %v704_v34 }
 0x332   : > { %1107 = vmatmul.msk.bf16.vlgmr.msra.gmra.mxu0 %vm574_vm2, %v702_v35 }
 0x38d   : > { %v663_v36 = vpop.f32.mrf.mxu2 }
 0x38e   : > { %v667_v37 = vpack.c.bf16 %v663_v36, %v663_v36 }
 0x390   : > { %v779_v38 = vunpack.c.l.b16 %v667_v37 }
 0x392   : > { %v780_v39 = vpack.c.b16 %v779_v38, %v779_v38 }
 0x394   : > { %781 = vrot.lane.b32.xlu2 %v780_v39, %s1523_s7 }
 0x395   : > { %v665_v40 = vpop.f32.mrf.mxu2 }
 0x3a8   : > { %v773_v41 = vpop.f32.mrf.mxu2 }
 0x3a9   : > { %v777_v42 = vpack.c.bf16 %v773_v41, %v773_v41 }
 0x3ab   : > { %v789_v43 = vunpack.c.l.b16 %v777_v42 }
 0x3ad   : > { %v790_v44 = vpack.c.b16 %v789_v43, %v789_v43 }
 0x3af   : > { %v718_v45 = vpop.f32.mrf.mxu0  ;;  %791 = vrot.lane.b32.xlu2 %v790_v44, %s1524_s11 }
 0x3b0   : > { %v722_v46 = vpack.c.bf16 %v718_v45, %v718_v45  ;;  %v775_v47 = vpop.f32.mrf.mxu2 }
 0x3b2   : > { %v784_v48 = vunpack.c.l.b16 %v722_v46 }
 0x3b4   : > { %v785_v49 = vpack.c.b16 %v784_v48, %v784_v48 }
 0x3b6   : > { %786 = vrot.lane.b32.xlu0 %v785_v49, %s1525_s23 }
 0x3b7   : > { %v720_v50 = vpop.f32.mrf.mxu0 }
 0x3ee   : > { %v782_v53 = vpop.permute.xlu2 %781 }
 0x3ef   : > { %v795_v55 = vsel %vm554_vm1, %v609_v54, %v782_v53 }
 0x409   : > { %v792_v57 = vpop.permute.xlu2 %791 }
 0x428   : > { %v787_v56 = vpop.permute.xlu0 %786 }
 0x429   : > { %v797_v58 = vsel %vm574_vm2, %v795_v55, %v787_v56 }
 0x42a   : > { %v800_v59 = vsel %vm798_vm3, %v797_v58, %v792_v57 }
 0x42b   : > { %1118 = vmatmul.msk.bf16.vlgmr.msra.gmra.mxu3 %vm444_vm0, %v800_v59 }
 0x4ae   : > { %v831_v61 = vpop.f32.mrf.mxu3 }
 0x4af   : > { %v832_v63 = vadd.f32 %v1229_v60, %v831_v61 }
 0x4b1   : > { %v836_v0 = vadd.f32 %v835_v62, %v832_v63 }
 0x4b3   : > { %v837_v1 = vsel %vm444_vm0, %v836_v0, 0.0 }
 0x4b4   : > { %838 = vadd.xlane.f32.xlu1 %v837_v1 }
 0x4b6   : > { %v833_v2 = vpop.f32.mrf.mxu3 }
 0x527   : > { %v839_v10 = vpop.xlane.xlu1 %838 }
 0x528   : > { %v847_v11 = vmul.f32 %v846_v9, %v839_v10 }
 0x52a   : > { %v848_v12 = vsub.f32 %v836_v0, %v847_v11 }
 0x52c   : > { %v849_v13 = vmul.f32 %v848_v12, %v848_v12 }
 0x52e   : > { %v850_v14 = vsel %vm444_vm0, %v849_v13, 0.0 }
 0x52f   : > { %851 = vadd.xlane.f32.xlu0 %v850_v14 }
 0x5a2   : > { %v852_v15 = vpop.xlane.xlu0 %851 }
 0x5a3   : > { %v853_v16 = vmul.f32 %v852_v15, %v846_v9 }
 0x5a5   : > { %v854_v17 = vadd.f32 1e-05, %v853_v16 }
 0x5a7   : > { %1250 = vrsqrt.f32 %v854_v17  ;;  %vm861_vm6 = vweird.f32 %v854_v17 }
 0x5ad   : > { %v1251_v18 = vpop.eup %1250 }
 0x5ae   : > { %v856_v19 = vmul.f32 %v1251_v18, %v854_v17  ;;  %vm862_vm5 = vweird.f32 %v1251_v18 }
 0x5af   : > { %vm863_vm7 = vmor %vm861_vm6, %vm862_vm5 }
 0x5b0   : > { %v857_v20 = vmul.f32 %v1251_v18, %v856_v19 }
 0x5b2   : > { %v858_v21 = vmul.f32 0.5, %v857_v20 }
 0x5b4   : > { %v859_v22 = vsub.f32 1.5, %v858_v21 }
 0x5b6   : > { %v860_v23 = vmul.f32 %v1251_v18, %v859_v22 }
 0x5b8   : > { %v864_v25 = vsel %vm863_vm7, %v1251_v18, %v860_v23 }
 0x5b9   : > { %v865_v26 = vmul.f32 %v864_v25, %v848_v12 }
 0x5bb   : > { %v868_v28 = vmul.f32 %v1230_v24, %v865_v26 }
 0x5bd   : > { %v871_v29 = vadd.f32 %v1231_v27, %v868_v28 }
 0x5bf   : > { %872 = vst.msk [vmem:[%s419_s25] sm:$0xff] %vm444_vm0, %v871_v29 }
 0x5c0   : > { %1459 = shalt.err (!%p1456_p10)
}
 0x5c1   : > { %1151 = dma.vmem_to_hbm [thread:$0]  (%p1631_p0), %s887_s8, 128, %s889_s0, %s874_s28  }
 0x5c2 PF: > { %s900_s5 = sand.u32 1, %s1502_s21   ;;  %p1894_p11 = scmp.ge.s32.totalorder %s1514_s24, 2 }
 0x5c3   : > { %s901_s16 = scalar_lea.sflag [#allocation4], %s900_s5 }
 0x5c4   : > { %p1174_p3 = pnand %p1894_p11, %p1639_p5 }
 0x5c6   : > { %p1175_p8 = pneg %p1174_p3 }
 0x5c8   : > { %1497 = dma.done.wait (%p1175_p8), %s901_s16, 128  }
 0x5c9   : > { %1499 = vsyncadd (%p1175_p8), %s901_s16, 4294967168  ;;  %s1895_s13 = sld [smem:[#allocation20_spill]]  ;;  %p26_p9 = scmp.ge.s32.totalorder %s1611_s12, 4  }
 0x5ca   : > { %s1896_s23 = sld [smem:[#allocation21_spill]]  ;;  %s1897_s21 = smov %s1506_s22 }
 0x5cb   : > { %s1899_s24 = smov %s1611_s12  ;;  %28 = sbr.rel (!%p26_p9) target bundleno = 15 (0xf), region = 137 }
 0x5cf   : > { %s1898_s22 = smov %s1895_s13 }
 0x5d0   :  { %907 = vsyncpa [#allocation3], 1 }
 0x5d1   :  { %909 = vsyncpa [#allocation3 + $0x1], 1 }
 0x5d2   :  { %910 = vsyncpa [#allocation6], 1 }
 0x5d3   :  { %912 = vsyncpa [#allocation6 + $0x1], 1 }
 0x5d4   :  { %913 = vsyncpa [#allocation9], 1 }
 0x5d5   :  { %915 = vsyncpa [#allocation9 + $0x1], 1 }
 0x5d6   :  { %916 = vsyncpa [#allocation12], 1 }
 0x5d7   :  { %917 = vsyncpa [#allocation4], 1 }
 0x5d8   :  { %919 = vsyncpa [#allocation4 + $0x1], 1 }

</bundles_post_ra>
